<compile_context>
chip_gen: v5e
topology: v5e:2x2
jax: 0.10.0
libtpu: 0.0.40
codegen_flags: <defaults>
</compile_context>

<pallas_src>
import jax
import jax.numpy as jnp
from jax.experimental import pallas as pl
from jax.experimental.pallas import tpu as pltpu


def _decode_kernel(x_ref, h0_ref, wih_ref, whh_ref, b_ref, wout_ref, bout_ref,
                   out_ref, hfin_ref):
    """Whole forward pass in one invocation (no grid). x_ref is time-major."""
    T, B, E = x_ref.shape
    H = whh_ref.shape[0]
    V = wout_ref.shape[1]

    # Load weights once (avoid re-issuing ref loads inside the unrolled loop).
    w_ih = wih_ref[...]                      # (E, H)
    w_hh = whh_ref[...]                      # (H, H)

    # ---- Hoisted input projection: one batched MXU call over all T*B rows ---
    # p[t, b, :] = x[t, b, :] @ W_ih + (b_ih + b_hh), kept time-major so p[t]
    # is a tile-slab read in the recurrence (no per-step cross-sublane extract).
    x_flat = x_ref[...].reshape(T * B, E)
    p = (jnp.dot(x_flat, w_ih, preferred_element_type=jnp.float32)
         + b_ref[...]).reshape(T, B, H)

    # ---- Serial recurrence: only h @ W_hh stays on the critical path --------
    h = h0_ref[...].astype(jnp.float32)      # (B, H)
    hs = []                                  # h_t history lives in registers
    for t in range(T):                       # static, fully unrolled
        h = jnp.tanh(p[t]
                     + jnp.dot(h, w_hh, preferred_element_type=jnp.float32))
        hs.append(h)
    hfin_ref[...] = h.astype(hfin_ref.dtype)  # final hidden state (B, H)

    # ---- Hoisted output projection + ReLU: one lane-dense (B*T, V) GEMM -----
    # Stack in (b, t) row-major order so the (B*T, V) -> (B, T, V) reshape of
    # the logits matches PyTorch's batch-first output layout.
    hs_bt = jnp.stack(hs, axis=1).reshape(B * T, H)          # (B*T, H)
    logits = (jnp.dot(hs_bt, wout_ref[...], preferred_element_type=jnp.float32)
              + bout_ref[...])                               # (B*T, V)
    out_ref[...] = jnp.maximum(logits, 0.0).reshape(B, T, V).astype(out_ref.dtype)


@jax.jit
def decode_model_forward(embed_prev, hidden, encoder_outputs, params):
    """Pallas implementation of DecodeModel.forward.

    embed_prev:       (B, T, E)   float32  (batch_first, like PyTorch)
    hidden:           (1, B, H)   float32  (num_layers=1)
    encoder_outputs:  unused (kept for interface parity)
    returns (output (B, T, V), hidden (1, B, H))
    """
    del encoder_outputs  # unused by the reference forward()

    w_ih, w_hh, b_combined, w_out, b_out = params
    B, T, E = embed_prev.shape
    H = w_hh.shape[0]
    V = w_out.shape[1]

    # Layout plumbing only: present the input time-major so the kernel's
    # per-step slice is contiguous.  Tiny XLA copy, off the kernel's chain.
    x_tm = jnp.transpose(embed_prev, (1, 0, 2))              # (T, B, E)

    cost = pl.CostEstimate(
        flops=2 * B * T * (E * H + H * H + H * V),
        transcendentals=B * T * H,
        bytes_accessed=4 * (B * T * E + B * H + E * H + H * H + H
                            + H * V + V + B * T * V + B * H),
    )

    vmem = pltpu.MemorySpace.VMEM
    output, h_final = pl.pallas_call(
        _decode_kernel,
        out_shape=(
            jax.ShapeDtypeStruct((B, T, V), jnp.float32),
            jax.ShapeDtypeStruct((B, H), jnp.float32),
        ),
        in_specs=[pl.BlockSpec(memory_space=vmem)] * 7,
        out_specs=(pl.BlockSpec(memory_space=vmem),
                   pl.BlockSpec(memory_space=vmem)),
        cost_estimate=cost,
    )(x_tm, hidden[0], w_ih, w_hh, b_combined, w_out, b_out)

    return output, h_final[None]                             # hidden -> (1, B, H)


def _reference_forward(embed_prev, hidden, params):
    """Pure-JAX reference (matches PyTorch nn.RNN(tanh) + Linear + ReLU)."""
    w_ih, w_hh, b, w_out, b_out = params

    def step(h, x_t):
        h_new = jnp.tanh(x_t @ w_ih + h @ w_hh + b)
        return h_new, h_new

    x_tm = jnp.transpose(embed_prev, (1, 0, 2))      # (T, B, E)
    h_final, hs = jax.lax.scan(step, hidden[0], x_tm)
    out = jnp.maximum(hs @ w_out + b_out, 0.0)       # (T, B, V)
    return jnp.transpose(out, (1, 0, 2)), h_final[None]


def _init_params(key, embed_dim, hidden_dim, vocab_size):
    """Deterministic init mimicking PyTorch's uniform(-1/sqrt(H), 1/sqrt(H))."""
    k1, k2, k3, k4, k5, k6 = jax.random.split(key, 6)
    s_rnn = 1.0 / jnp.sqrt(hidden_dim)
    s_lin = 1.0 / jnp.sqrt(hidden_dim)
    # Stored pre-transposed: (in_features, out_features)
    w_ih = jax.random.uniform(k1, (embed_dim, hidden_dim), jnp.float32, -s_rnn, s_rnn)
    w_hh = jax.random.uniform(k2, (hidden_dim, hidden_dim), jnp.float32, -s_rnn, s_rnn)
    b_ih = jax.random.uniform(k3, (1, hidden_dim), jnp.float32, -s_rnn, s_rnn)
    b_hh = jax.random.uniform(k4, (1, hidden_dim), jnp.float32, -s_rnn, s_rnn)
    w_out = jax.random.uniform(k5, (hidden_dim, vocab_size), jnp.float32, -s_lin, s_lin)
    b_out = jax.random.uniform(k6, (1, vocab_size), jnp.float32, -s_lin, s_lin)
    return (w_ih, w_hh, b_ih + b_hh, w_out, b_out)


if __name__ == "__main__":
    # Small shapes consistent with the module's forward:
    #   embed_prev: (B, T, embed_dim), hidden: (1, B, hidden_dim)
    B, T, EMBED, HIDDEN, VOCAB = 2, 8, 32, 32, 128

    key = jax.random.PRNGKey(0)
    k_x, k_h, k_e, k_p = jax.random.split(key, 4)

    embed_prev = jax.random.normal(k_x, (B, T, EMBED), jnp.float32)
    hidden0 = jax.random.normal(k_h, (1, B, HIDDEN), jnp.float32)
    encoder_outputs = jax.random.normal(k_e, (B, T, HIDDEN), jnp.float32)  # unused
    params = _init_params(k_p, EMBED, HIDDEN, VOCAB)

    output, hidden = decode_model_forward(embed_prev, hidden0, encoder_outputs, params)
    output = jax.block_until_ready(output)
    hidden = jax.block_until_ready(hidden)

    # Numeric check against a pure-JAX reference of the same math.
    ref_out, ref_h = _reference_forward(embed_prev, hidden0, params)
    assert output.shape == (B, T, VOCAB) and hidden.shape == (1, B, HIDDEN)
    assert jnp.allclose(output, ref_out, atol=5e-4, rtol=5e-4)
    assert jnp.allclose(hidden, ref_h, atol=5e-4, rtol=5e-4)

    print("KERNEL_OK")
</pallas_src>

<mosaic_0001>
module attributes {stable_mosaic.version = 11 : i64} {
  func.func @_decode_kernel(%arg0: memref<8x2x32xf32, #tpu.memory_space<vmem>>, %arg1: memref<2x32xf32, #tpu.memory_space<vmem>>, %arg2: memref<32x32xf32, #tpu.memory_space<vmem>>, %arg3: memref<32x32xf32, #tpu.memory_space<vmem>>, %arg4: memref<1x32xf32, #tpu.memory_space<vmem>>, %arg5: memref<32x128xf32, #tpu.memory_space<vmem>>, %arg6: memref<1x128xf32, #tpu.memory_space<vmem>>, %arg7: memref<2x8x128xf32, #tpu.memory_space<vmem>>, %arg8: memref<2x32xf32, #tpu.memory_space<vmem>>) attributes {dimension_semantics = [], scalar_prefetch = 0 : i64, scratch_operands = 0 : i64, tpu.core_type = #tpu.core_type<tc>} {
    %c0 = arith.constant 0 : index
    %c0_0 = arith.constant 0 : index
    %0 = vector.load %arg2[%c0, %c0_0] : memref<32x32xf32, #tpu.memory_space<vmem>>, vector<32x32xf32>
    %c0_1 = arith.constant 0 : index
    %c0_2 = arith.constant 0 : index
    %1 = vector.load %arg3[%c0_1, %c0_2] : memref<32x32xf32, #tpu.memory_space<vmem>>, vector<32x32xf32>
    %c0_3 = arith.constant 0 : index
    %c0_4 = arith.constant 0 : index
    %c0_5 = arith.constant 0 : index
    %2 = vector.load %arg0[%c0_3, %c0_4, %c0_5] : memref<8x2x32xf32, #tpu.memory_space<vmem>>, vector<8x2x32xf32>
    %3 = vector.shape_cast %2 : vector<8x2x32xf32> to vector<16x32xf32>
    %cst = arith.constant dense<0.000000e+00> : vector<16x32xf32>
    %4 = tpu.matmul %3, %0, %cst {dimension_numbers = #tpu.dot_dimension_numbers<[1], [0], [0], [1], [0, 0, 1, 1], [], []>} : vector<16x32xf32>, vector<32x32xf32>, vector<16x32xf32> -> vector<16x32xf32>
    %c0_6 = arith.constant 0 : index
    %c0_7 = arith.constant 0 : index
    %5 = vector.load %arg4[%c0_6, %c0_7] : memref<1x32xf32, #tpu.memory_space<vmem>>, vector<1x32xf32>
    %6 = vector.broadcast %5 : vector<1x32xf32> to vector<16x32xf32>
    %7 = arith.addf %4, %6 : vector<16x32xf32>
    %8 = vector.shape_cast %7 : vector<16x32xf32> to vector<8x2x32xf32>
    %c0_8 = arith.constant 0 : index
    %c0_9 = arith.constant 0 : index
    %9 = vector.load %arg1[%c0_8, %c0_9] : memref<2x32xf32, #tpu.memory_space<vmem>>, vector<2x32xf32>
    %10 = vector.extract_strided_slice %8 {offsets = [0, 0, 0], sizes = [1, 2, 32], strides = [1, 1, 1]} : vector<8x2x32xf32> to vector<1x2x32xf32>
    %11 = vector.shape_cast %10 : vector<1x2x32xf32> to vector<2x32xf32>
    %cst_10 = arith.constant dense<0.000000e+00> : vector<2x32xf32>
    %12 = tpu.matmul %9, %1, %cst_10 {dimension_numbers = #tpu.dot_dimension_numbers<[1], [0], [0], [1], [0, 0, 1, 1], [], []>} : vector<2x32xf32>, vector<32x32xf32>, vector<2x32xf32> -> vector<2x32xf32>
    %13 = arith.addf %11, %12 : vector<2x32xf32>
    %14 = math.tanh %13 : vector<2x32xf32>
    %15 = vector.extract_strided_slice %8 {offsets = [1, 0, 0], sizes = [1, 2, 32], strides = [1, 1, 1]} : vector<8x2x32xf32> to vector<1x2x32xf32>
    %16 = vector.shape_cast %15 : vector<1x2x32xf32> to vector<2x32xf32>
    %cst_11 = arith.constant dense<0.000000e+00> : vector<2x32xf32>
    %17 = tpu.matmul %14, %1, %cst_11 {dimension_numbers = #tpu.dot_dimension_numbers<[1], [0], [0], [1], [0, 0, 1, 1], [], []>} : vector<2x32xf32>, vector<32x32xf32>, vector<2x32xf32> -> vector<2x32xf32>
    %18 = arith.addf %16, %17 : vector<2x32xf32>
    %19 = math.tanh %18 : vector<2x32xf32>
    %20 = vector.extract_strided_slice %8 {offsets = [2, 0, 0], sizes = [1, 2, 32], strides = [1, 1, 1]} : vector<8x2x32xf32> to vector<1x2x32xf32>
    %21 = vector.shape_cast %20 : vector<1x2x32xf32> to vector<2x32xf32>
    %cst_12 = arith.constant dense<0.000000e+00> : vector<2x32xf32>
    %22 = tpu.matmul %19, %1, %cst_12 {dimension_numbers = #tpu.dot_dimension_numbers<[1], [0], [0], [1], [0, 0, 1, 1], [], []>} : vector<2x32xf32>, vector<32x32xf32>, vector<2x32xf32> -> vector<2x32xf32>
    %23 = arith.addf %21, %22 : vector<2x32xf32>
    %24 = math.tanh %23 : vector<2x32xf32>
    %25 = vector.extract_strided_slice %8 {offsets = [3, 0, 0], sizes = [1, 2, 32], strides = [1, 1, 1]} : vector<8x2x32xf32> to vector<1x2x32xf32>
    %26 = vector.shape_cast %25 : vector<1x2x32xf32> to vector<2x32xf32>
    %cst_13 = arith.constant dense<0.000000e+00> : vector<2x32xf32>
    %27 = tpu.matmul %24, %1, %cst_13 {dimension_numbers = #tpu.dot_dimension_numbers<[1], [0], [0], [1], [0, 0, 1, 1], [], []>} : vector<2x32xf32>, vector<32x32xf32>, vector<2x32xf32> -> vector<2x32xf32>
    %28 = arith.addf %26, %27 : vector<2x32xf32>
    %29 = math.tanh %28 : vector<2x32xf32>
    %30 = vector.extract_strided_slice %8 {offsets = [4, 0, 0], sizes = [1, 2, 32], strides = [1, 1, 1]} : vector<8x2x32xf32> to vector<1x2x32xf32>
    %31 = vector.shape_cast %30 : vector<1x2x32xf32> to vector<2x32xf32>
    %cst_14 = arith.constant dense<0.000000e+00> : vector<2x32xf32>
    %32 = tpu.matmul %29, %1, %cst_14 {dimension_numbers = #tpu.dot_dimension_numbers<[1], [0], [0], [1], [0, 0, 1, 1], [], []>} : vector<2x32xf32>, vector<32x32xf32>, vector<2x32xf32> -> vector<2x32xf32>
    %33 = arith.addf %31, %32 : vector<2x32xf32>
    %34 = math.tanh %33 : vector<2x32xf32>
    %35 = vector.extract_strided_slice %8 {offsets = [5, 0, 0], sizes = [1, 2, 32], strides = [1, 1, 1]} : vector<8x2x32xf32> to vector<1x2x32xf32>
    %36 = vector.shape_cast %35 : vector<1x2x32xf32> to vector<2x32xf32>
    %cst_15 = arith.constant dense<0.000000e+00> : vector<2x32xf32>
    %37 = tpu.matmul %34, %1, %cst_15 {dimension_numbers = #tpu.dot_dimension_numbers<[1], [0], [0], [1], [0, 0, 1, 1], [], []>} : vector<2x32xf32>, vector<32x32xf32>, vector<2x32xf32> -> vector<2x32xf32>
    %38 = arith.addf %36, %37 : vector<2x32xf32>
    %39 = math.tanh %38 : vector<2x32xf32>
    %40 = vector.extract_strided_slice %8 {offsets = [6, 0, 0], sizes = [1, 2, 32], strides = [1, 1, 1]} : vector<8x2x32xf32> to vector<1x2x32xf32>
    %41 = vector.shape_cast %40 : vector<1x2x32xf32> to vector<2x32xf32>
    %cst_16 = arith.constant dense<0.000000e+00> : vector<2x32xf32>
    %42 = tpu.matmul %39, %1, %cst_16 {dimension_numbers = #tpu.dot_dimension_numbers<[1], [0], [0], [1], [0, 0, 1, 1], [], []>} : vector<2x32xf32>, vector<32x32xf32>, vector<2x32xf32> -> vector<2x32xf32>
    %43 = arith.addf %41, %42 : vector<2x32xf32>
    %44 = math.tanh %43 : vector<2x32xf32>
    %45 = vector.extract_strided_slice %8 {offsets = [7, 0, 0], sizes = [1, 2, 32], strides = [1, 1, 1]} : vector<8x2x32xf32> to vector<1x2x32xf32>
    %46 = vector.shape_cast %45 : vector<1x2x32xf32> to vector<2x32xf32>
    %cst_17 = arith.constant dense<0.000000e+00> : vector<2x32xf32>
    %47 = tpu.matmul %44, %1, %cst_17 {dimension_numbers = #tpu.dot_dimension_numbers<[1], [0], [0], [1], [0, 0, 1, 1], [], []>} : vector<2x32xf32>, vector<32x32xf32>, vector<2x32xf32> -> vector<2x32xf32>
    %48 = arith.addf %46, %47 : vector<2x32xf32>
    %49 = math.tanh %48 : vector<2x32xf32>
    %c0_18 = arith.constant 0 : index
    %c0_19 = arith.constant 0 : index
    %50 = vector.load %arg8[%c0_18, %c0_19] : memref<2x32xf32, #tpu.memory_space<vmem>>, vector<2x32xf32>
    tpu.vector_store %arg8[%c0_18, %c0_19], %49 {strides = array<i32>} : memref<2x32xf32, #tpu.memory_space<vmem>>, vector<2x32xf32>,
    %51 = vector.shape_cast %14 : vector<2x32xf32> to vector<2x1x32xf32>
    %52 = vector.shape_cast %19 : vector<2x32xf32> to vector<2x1x32xf32>
    %53 = vector.shape_cast %24 : vector<2x32xf32> to vector<2x1x32xf32>
    %54 = vector.shape_cast %29 : vector<2x32xf32> to vector<2x1x32xf32>
    %55 = vector.shape_cast %34 : vector<2x32xf32> to vector<2x1x32xf32>
    %56 = vector.shape_cast %39 : vector<2x32xf32> to vector<2x1x32xf32>
    %57 = vector.shape_cast %44 : vector<2x32xf32> to vector<2x1x32xf32>
    %58 = vector.shape_cast %49 : vector<2x32xf32> to vector<2x1x32xf32>
    %59 = tpu.concatenate %51, %52, %53, %54, %55, %56, %57, %58 in 1 : vector<2x1x32xf32>, vector<2x1x32xf32>, vector<2x1x32xf32>, vector<2x1x32xf32>, vector<2x1x32xf32>, vector<2x1x32xf32>, vector<2x1x32xf32>, vector<2x1x32xf32> -> vector<2x8x32xf32>
    %60 = vector.shape_cast %59 : vector<2x8x32xf32> to vector<16x32xf32>
    %c0_20 = arith.constant 0 : index
    %c0_21 = arith.constant 0 : index
    %61 = vector.load %arg5[%c0_20, %c0_21] : memref<32x128xf32, #tpu.memory_space<vmem>>, vector<32x128xf32>
    %cst_22 = arith.constant dense<0.000000e+00> : vector<16x128xf32>
    %62 = tpu.matmul %60, %61, %cst_22 {dimension_numbers = #tpu.dot_dimension_numbers<[1], [0], [0], [1], [0, 0, 1, 1], [], []>} : vector<16x32xf32>, vector<32x128xf32>, vector<16x128xf32> -> vector<16x128xf32>
    %c0_23 = arith.constant 0 : index
    %c0_24 = arith.constant 0 : index
    %63 = vector.load %arg6[%c0_23, %c0_24] : memref<1x128xf32, #tpu.memory_space<vmem>>, vector<1x128xf32>
    %64 = vector.broadcast %63 : vector<1x128xf32> to vector<16x128xf32>
    %65 = arith.addf %62, %64 : vector<16x128xf32>
    %cst_25 = arith.constant 0.000000e+00 : f32
    %66 = vector.broadcast %cst_25 : f32 to vector<16x128xf32>
    %67 = arith.maximumf %65, %66 : vector<16x128xf32>
    %68 = vector.shape_cast %67 : vector<16x128xf32> to vector<2x8x128xf32>
    %c0_26 = arith.constant 0 : index
    %c0_27 = arith.constant 0 : index
    %c0_28 = arith.constant 0 : index
    %69 = vector.load %arg7[%c0_26, %c0_27, %c0_28] : memref<2x8x128xf32, #tpu.memory_space<vmem>>, vector<2x8x128xf32>
    tpu.vector_store %arg7[%c0_26, %c0_27, %c0_28], %68 {strides = array<i32>} : memref<2x8x128xf32, #tpu.memory_space<vmem>>, vector<2x8x128xf32>,
    return
  }
}

</mosaic_0001>

<bundles_post_ra>
// kernel: decode_model_forward.1
= control target key start
LH: loop header
LB: loop body
LE: loop exit
PB: predicated region body
PF: predicated region fallthrough
CT: control target
= control target key end

     0   :  { %14 = vsyncpa [#allocation3], 0  ;;  %s902_s0 = inlined_call_operand.vmem [shape: f32[8,2,32], index: 0, kind: input, shape index: {}]   ;;  %s903_s1 = inlined_call_operand.vmem [shape: f32[2,32], index: 1, kind: input, shape index: {}]   ;;  %s904_s2 = inlined_call_operand.vmem [shape: f32[32,32], index: 2, kind: input, shape index: {}]   ;;  %s905_s3 = inlined_call_operand.hbm [shape: f32[32,32], index: 3, kind: input, shape index: {}]   ;;  %s906_s4 = inlined_call_operand.vmem [shape: f32[1,32], index: 4, kind: input, shape index: {}]   ;;  %s907_s5 = inlined_call_operand.hbm [shape: f32[32,128], index: 5, kind: input, shape index: {}]   ;;  %s908_s6 = inlined_call_operand.vmem [shape: f32[1,128], index: 6, kind: input, shape index: {}]   ;;  %s909_s7 = inlined_call_operand.hbm [shape: f32[2,8,128], index: 7, kind: output, shape index: {0}]   ;;  %s910_s8 = inlined_call_operand.hbm [shape: f32[2,32], index: 8, kind: output, shape index: {1}]  }
   0x1   :  { %15 = vsyncpa [#allocation6], 0 }
   0x2   :  { %16 = vsyncpa [#allocation4], 0 }
   0x3   :  { %17 = vsyncpa [#allocation9], 0  ;;  %s28_s29 = sshll.u32 %s905_s3, 4  ;;  %s705_s30 = smov [#allocation2]   ;;  %s29_s29 = int_to_ptr.hbm [resolvable:$true] %s28_s29 }
   0x4   :  { %s30_s9 = sshll.u32 %s705_s30, 4  ;;  %s43_s12 = sshll.u32 %s907_s5, 4  ;;  %s31_s9 = int_to_ptr.vmem [resolvable:$true] %s30_s9  ;;  %s44_s12 = int_to_ptr.hbm [resolvable:$true] %s43_s12 }
   0x5   :  { %s706_s13 = smov 128   ;;  %s707_s14 = smov 8  }
   0x6   :  { %36 = dma.hbm_to_vmem [thread:$0]  %s29_s29, 512, %s31_s9, [#allocation3], %s706_s13, %s706_s13, %s707_s14  }
   0x7   :  { %s708_s15 = smov [#allocation5]  }
   0x8   :  { %s45_s16 = sshll.u32 %s708_s15, 4  ;;  %s46_s16 = int_to_ptr.vmem [resolvable:$true] %s45_s16 }
   0x9   :  { %51 = dma.hbm_to_vmem [thread:$0]  %s44_s12, 512, %s46_s16, [#allocation6], %s706_s13, %s706_s13, %s707_s14  }
   0xa   :  { %697 = dma.done.wait [#allocation3], 512  }
   0xb   :  { %698 = vsyncadd [#allocation3], 4294966784 }
   0xc   :  { %699 = dma.done.wait [#allocation6], 512  }
   0xd   :  { %700 = vsyncadd [#allocation6], 4294966784  ;;  %v65_v0 = vld [vmem:[%s904_s2 + $0x18] sm:$0xff]  ;;  %v64_v1 = vld [vmem:[%s904_s2 + $0x10] sm:$0xff]  ;;  %vm107_vm0 = vcmask 261120   ;;  %vm361_vm1 = vcmask 1041409  }
   0xe   :  { %v69_v2 = vld [vmem:[#allocation2 + $0x18] sm:$0xff]  ;;  %124 = vmatpush.msra.mxu0 %v65_v0  ;;  %v63_v3 = vld [vmem:[%s904_s2 + $0x8] sm:$0xff]  ;;  %v68_v4 = vld [vmem:[#allocation2 + $0x10] sm:$0xff]  ;;  %vm363_vm2 = vcmask 1043459   ;;  %vm355_vm3 = vcmask 1040384   ;;  %vm357_vm4 = vcmask 1042434  }
   0xf   :  { %165 = vmatpush.msra.mxu1 %v69_v2  ;;  %v67_v5 = vld [vmem:[#allocation2 + $0x8] sm:$0xff]  ;;  %v70_v6 = vld [vmem:[%s902_s0] sm:$0x3]  ;;  %v71_v7 = vld [vmem:[%s902_s0 + $0x2] sm:$0x3]  ;;  %190 = vmatpush.msra.mxu3 %v69_v2  ;;  %vm365_vm5 = vcmask 1042433  }
  0x10   :  { %265 = vmatpush.msra.mxu2 %v69_v2  ;;  %125 = vmatpush.msra.mxu0 %v64_v1  ;;  %v72_v8 = vld [vmem:[%s902_s0 + $0x4] sm:$0x3]  ;;  %v73_v9 = vld [vmem:[%s902_s0 + $0x6] sm:$0x3]  ;;  %90 = vst [vmem:[#allocation1] ss:$4 sm:$0xff] %v70_v6 }
  0x11   :  { %166 = vmatpush.msra.mxu1 %v68_v4  ;;  %v62_v10 = vld [vmem:[%s904_s2] sm:$0xff]  ;;  %92 = vst [vmem:[#allocation1 + $0x1] ss:$4 sm:$0xff] %v71_v7  ;;  %v66_v11 = vld [vmem:[#allocation2] sm:$0xff]  ;;  %191 = vmatpush.msra.mxu3 %v68_v4  ;;  %vm359_vm6 = vcmask 1041408   ;;  %vm473_vm7 = vcmask 1042432  }
  0x12   :  { %266 = vmatpush.msra.mxu2 %v68_v4  ;;  %126 = vmatpush.msra.mxu0 %v63_v3  ;;  %94 = vst [vmem:[#allocation1 + $0x2] ss:$4 sm:$0xff] %v72_v8  ;;  %v149_v12 = vld [vmem:[%s903_s1] sm:$0x3]  ;;  %v75_v3 = vld [vmem:[%s902_s0 + $0xa] sm:$0x3] }
  0x13   :  { %167 = vmatpush.msra.mxu1 %v67_v5  ;;  %96 = vst [vmem:[#allocation1 + $0x3] ss:$4 sm:$0xff] %v73_v9  ;;  %192 = vmatpush.msra.mxu3 %v67_v5  ;;  %v800_v14 = vld [vmem:[%s906_s4] ss:$0 sm:$0xff]  ;;  %vm476_vm8 = vcmask 1043456   ;;  %vm479_vm9 = vcmask 1044480  }
  0x14   :  { %267 = vmatpush.msra.mxu2 %v67_v5  ;;  %127 = vmatpush.msra.mxu0 %v62_v10  ;;  %100 = vst [vmem:[#allocation1 + $0x21] ss:$4 sm:$0xff] %v75_v3  ;;  %vm482_vm10 = vcmask 1045504   ;;  %vm350_vm11 = vcmask 254976   ;;  %vm485_vm12 = vcmask 1046528   ;;  %s549_s21 = sshll.u32 %s910_s8, 4  ;;  %s550_s21 = int_to_ptr.hbm [resolvable:$true] %s549_s21 }
  0x15   :  { %168 = vmatpush.msra.mxu1 %v66_v11  ;;  %193 = vmatpush.msra.mxu3 %v66_v11  ;;  %s710_s24 = smov [#allocation7]   ;;  %s535_s28 = sshll.u32 %s909_s7, 4  ;;  %s536_s28 = int_to_ptr.hbm [resolvable:$true] %s535_s28 }
  0x16   :  { %567 = vmatmul.msk.f32.vlgmr.msra.gmra.mxu1 %vm107_vm0, %v149_v12  ;;  %268 = vmatpush.msra.mxu2 %v66_v11  ;;  %s533_s25 = sshll.u32 %s710_s24, 4  ;;  %s534_s25 = int_to_ptr.vmem [resolvable:$true] %s533_s25 }
  0x17   :  { %215 = vmatpush.msrb.mxu3 %v69_v2  ;;  %240 = vmatpush.msrb.mxu1 %v69_v2 }
  0x18   :  { %315 = vmatpush.msrb.mxu0 %v69_v2 }
  0x19   :  { %216 = vmatpush.msrb.mxu3 %v68_v4  ;;  %241 = vmatpush.msrb.mxu1 %v68_v4 }
  0x1a   :  { %316 = vmatpush.msrb.mxu0 %v68_v4  ;;  %v105_v13 = vld.sshfl [vmem:[#allocation1] sm:$0xff pattern:$0x73625140] }
  0x1b   :  { %217 = vmatpush.msrb.mxu3 %v67_v5  ;;  %242 = vmatpush.msrb.mxu1 %v67_v5 }
  0x1c   :  { %565 = vmatmul.msk.f32.vlgmr.msra.gmra.mxu0 %vm107_vm0, %v105_v13 }
  0x1d   :  { %218 = vmatpush.msrb.mxu3 %v66_v11  ;;  %243 = vmatpush.msrb.mxu1 %v66_v11 }
  0x1e   :  { %317 = vmatpush.msrb.mxu0 %v67_v5 }
  0x1f   :  { %340 = vmatpush.msra.mxu1 %v69_v2 }
  0x20   :  { %318 = vmatpush.msrb.mxu0 %v66_v11 }
  0x21   :  { %341 = vmatpush.msra.mxu1 %v68_v4 }
  0x23   :  { %342 = vmatpush.msra.mxu1 %v67_v5 }
  0x25   :  { %343 = vmatpush.msra.mxu1 %v66_v11 }
  0x93   :  { %v170_v16 = vpop.f32.mrf.mxu1 }
  0x99   :  { %v129_v15 = vpop.f32.mrf.mxu0 }
  0x9a   :  { %v803_v17 = vadd.f32 %v800_v14, %v129_v15 }
  0x9c   :  { %v173_v18 = vadd.f32 %v170_v16, %v803_v17  ;;  %v137_v20 = vrot.slane %v803_v17, 2  ;;  %v138_v48 = vrot.slane %v803_v17, 4  ;;  %v139_v7 = vrot.slane %v803_v17, 6 }
  0x9e   :  { %585 = vtanh.f32 %v173_v18 }
  0xa4   :  { %v586_v19 = vpop.eup %585 }
  0xa5   :  { %568 = vmatmul.msk.f32.vlgmr.msra.gmra.mxu3 %vm107_vm0, %v586_v19  ;;  %v352_v23 = vrot.slane %v586_v19, 1  ;;  %v353_v24 = vrot.slane %v586_v19, 2  ;;  %v354_v25 = vrot.slane %v586_v19, 3 }
  0xa6   :  { %290 = vmatpush.msra.mxu3 %v69_v2  ;;  %v74_v2 = vld [vmem:[%s902_s0 + $0x8] sm:$0x3] }
  0xa7   :  { %v362_v27 = vsel %vm361_vm1, %v586_v19, %v352_v23  ;;  %v364_v31 = vsel %vm363_vm2, %v353_v24, %v354_v25  ;;  %v356_v32 = vsel %vm355_vm3, %v586_v19, %v352_v23  ;;  %v358_v33 = vsel %vm357_vm4, %v353_v24, %v354_v25  ;;  %98 = vst [vmem:[#allocation1 + $0x20] ss:$4 sm:$0xff] %v74_v2 }
  0xa8   :  { %291 = vmatpush.msra.mxu3 %v68_v4  ;;  %v366_v39 = vsel %vm365_vm5, %v362_v27, %v364_v31  ;;  %v360_v43 = vsel %vm359_vm6, %v356_v32, %v358_v33  ;;  %v76_v4 = vld [vmem:[%s902_s0 + $0xc] sm:$0x3] }
  0xa9   :  { %v367_v45 = vrot.slane %v366_v39, 1  ;;  %102 = vst [vmem:[#allocation1 + $0x22] ss:$4 sm:$0xff] %v76_v4 }
  0xaa   :  { %292 = vmatpush.msra.mxu3 %v67_v5  ;;  %v77_v5 = vld [vmem:[%s902_s0 + $0xe] sm:$0x3]  ;;  %s709_s0 = smov [#allocation8]  }
  0xab   :  { %104 = vst [vmem:[#allocation1 + $0x23] ss:$4 sm:$0xff] %v77_v5  ;;  %s547_s18 = sshll.u32 %s709_s0, 4  ;;  %s548_s18 = int_to_ptr.vmem [resolvable:$true] %s547_s18 }
  0xac   :  { %293 = vmatpush.msra.mxu3 %v66_v11 }
  0xb2   :  { %v106_v6 = vld.sshfl [vmem:[#allocation1 + $0x20] sm:$0xff pattern:$0x73625140] }
  0xb3   :  { %566 = vmatmul.msk.f32.gmra.mxu0 %vm107_vm0, %v106_v6 }
 0x128   :  { %v195_v21 = vpop.f32.mrf.mxu3 }
 0x129   :  { %v198_v22 = vadd.f32 %v195_v21, %v137_v20 }
 0x12b   :  { %587 = vtanh.f32 %v198_v22 }
 0x131   :  { %v588_v26 = vpop.eup %587 }
 0x132   :  { %569 = vmatmul.msk.f32.vlgmr.msrb.gmra.mxu3 %vm107_vm0, %v588_v26  ;;  %v370_v28 = vrot.slane %v588_v26, 1  ;;  %v371_v29 = vrot.slane %v588_v26, 2  ;;  %v372_v30 = vrot.slane %v588_v26, 3 }
 0x134   :  { %v373_v34 = vsel %vm355_vm3, %v588_v26, %v370_v28  ;;  %v374_v35 = vsel %vm357_vm4, %v371_v29, %v372_v30  ;;  %v376_v36 = vsel %vm361_vm1, %v588_v26, %v370_v28  ;;  %v377_v37 = vsel %vm363_vm2, %v371_v29, %v372_v30  ;;  %v132_v26 = vpop.f32.mrf.mxu0 }
 0x135   :  { %v375_v38 = vsel %vm359_vm6, %v373_v34, %v374_v35  ;;  %v378_v40 = vsel %vm365_vm5, %v376_v36, %v377_v37  ;;  %v855_v27 = vadd.f32 %v800_v14, %v132_v26 }
 0x136   :  { %v441_v41 = vperm.slane %v375_v38, 0  ;;  %v379_v42 = vrot.slane %v378_v40, 1 }
 0x138   :  { %v469_v44 = vsel %vm355_vm3, %v360_v43, %v441_v41  ;;  %v442_v46 = vperm.slane %v379_v42, 0 }
 0x13a   :  { %v470_v47 = vsel %vm355_vm3, %v367_v45, %v442_v46 }
 0x1b5   :  { %v220_v49 = vpop.f32.mrf.mxu3 }
 0x1b6   :  { %v223_v50 = vadd.f32 %v220_v49, %v138_v48 }
 0x1b8   :  { %589 = vtanh.f32 %v223_v50 }
 0x1be   :  { %v590_v51 = vpop.eup %589 }
 0x1bf   :  { %570 = vmatmul.msk.f32.vlgmr.msrb.gmra.mxu1 %vm107_vm0, %v590_v51  ;;  %v380_v52 = vrot.slane %v590_v51, 1  ;;  %v381_v53 = vrot.slane %v590_v51, 2  ;;  %v382_v54 = vrot.slane %v590_v51, 3 }
 0x1c1   :  { %v383_v55 = vsel %vm355_vm3, %v590_v51, %v380_v52  ;;  %v384_v56 = vsel %vm357_vm4, %v381_v53, %v382_v54  ;;  %v386_v57 = vsel %vm361_vm1, %v590_v51, %v380_v52  ;;  %v387_v58 = vsel %vm363_vm2, %v381_v53, %v382_v54 }
 0x1c2   :  { %v385_v59 = vsel %vm359_vm6, %v383_v55, %v384_v56  ;;  %v388_v60 = vsel %vm365_vm5, %v386_v57, %v387_v58 }
 0x1c3   :  { %v445_v61 = vperm.slane %v385_v59, 0  ;;  %v389_v62 = vrot.slane %v388_v60, 1 }
 0x1c5   :  { %v471_v63 = vsel %vm359_vm6, %v469_v44, %v445_v61  ;;  %v446_v0 = vperm.slane %v389_v62, 0  ;;  %v140_v44 = vrot.slane %v855_v27, 2  ;;  %v141_v62 = vrot.slane %v855_v27, 4 }
 0x1c7   :  { %v472_v1 = vsel %vm359_vm6, %v470_v47, %v446_v0 }
 0x23c   :  { %v245_v8 = vpop.f32.mrf.mxu1 }
 0x23d   :  { %v248_v9 = vadd.f32 %v245_v8, %v139_v7 }
 0x23f   :  { %591 = vtanh.f32 %v248_v9 }
 0x245   :  { %v592_v10 = vpop.eup %591 }
 0x246   :  { %571 = vmatmul.msk.f32.vlgmr.msra.gmra.mxu2 %vm107_vm0, %v592_v10  ;;  %v390_v11 = vrot.slane %v592_v10, 1  ;;  %v391_v12 = vrot.slane %v592_v10, 2  ;;  %v392_v13 = vrot.slane %v592_v10, 3 }
 0x248   :  { %v393_v15 = vsel %vm355_vm3, %v592_v10, %v390_v11  ;;  %v394_v16 = vsel %vm357_vm4, %v391_v12, %v392_v13  ;;  %v396_v18 = vsel %vm361_vm1, %v592_v10, %v390_v11  ;;  %v397_v19 = vsel %vm363_vm2, %v391_v12, %v392_v13 }
 0x249   :  { %v395_v20 = vsel %vm359_vm6, %v393_v15, %v394_v16  ;;  %v398_v17 = vsel %vm365_vm5, %v396_v18, %v397_v19  ;;  %v491_v18 = vld [vmem:[#allocation5 + $0x18] sm:$0xff]  ;;  %v490_v19 = vld [vmem:[#allocation5 + $0x10] sm:$0xff] }
 0x24a   :  { %v449_v21 = vperm.slane %v395_v20, 0  ;;  %v399_v22 = vrot.slane %v398_v17, 1  ;;  %514 = vmatpush.msrb.mxu2 %v491_v18  ;;  %v489_v20 = vld [vmem:[#allocation5 + $0x8] sm:$0xff]  ;;  %v488_v17 = vld [vmem:[#allocation5] sm:$0xff] }
 0x24c   :  { %v474_v23 = vsel %vm473_vm7, %v471_v63, %v449_v21  ;;  %v450_v24 = vperm.slane %v399_v22, 0  ;;  %515 = vmatpush.msrb.mxu2 %v490_v19  ;;  %v142_v21 = vrot.slane %v855_v27, 6 }
 0x24e   :  { %v475_v25 = vsel %vm473_vm7, %v472_v1, %v450_v24  ;;  %516 = vmatpush.msrb.mxu2 %v489_v20 }
 0x250   :  { %517 = vmatpush.msrb.mxu2 %v488_v17 }
 0x2c9   :  { %v270_v28 = vpop.f32.mrf.mxu2 }
 0x2ca   :  { %v273_v29 = vadd.f32 %v270_v28, %v855_v27 }
 0x2cc   :  { %593 = vtanh.f32 %v273_v29 }
 0x2d2   :  { %v594_v30 = vpop.eup %593 }
 0x2d3   :  { %572 = vmatmul.msk.f32.vlgmr.msra.gmra.mxu3 %vm107_vm0, %v594_v30  ;;  %v400_v31 = vrot.slane %v594_v30, 1  ;;  %v401_v32 = vrot.slane %v594_v30, 2  ;;  %v402_v33 = vrot.slane %v594_v30, 3 }
 0x2d5   :  { %v403_v34 = vsel %vm355_vm3, %v594_v30, %v400_v31  ;;  %v404_v35 = vsel %vm357_vm4, %v401_v32, %v402_v33  ;;  %v406_v36 = vsel %vm361_vm1, %v594_v30, %v400_v31  ;;  %v407_v37 = vsel %vm363_vm2, %v401_v32, %v402_v33 }
 0x2d6   :  { %v405_v14 = vsel %vm359_vm6, %v403_v34, %v404_v35  ;;  %v408_v38 = vsel %vm365_vm5, %v406_v36, %v407_v37 }
 0x2d7   :  { %v453_v39 = vperm.slane %v405_v14, 0  ;;  %v409_v40 = vrot.slane %v408_v38, 1  ;;  %v584_v38 = vld [vmem:[%s908_s6] ss:$0 sm:$0xff] }
 0x2d9   :  { %v477_v41 = vsel %vm476_vm8, %v474_v23, %v453_v39  ;;  %v454_v42 = vperm.slane %v409_v40, 0 }
 0x2db   :  { %v478_v43 = vsel %vm476_vm8, %v475_v25, %v454_v42 }
 0x356   :  { %v295_v45 = vpop.f32.mrf.mxu3 }
 0x357   :  { %v298_v46 = vadd.f32 %v295_v45, %v140_v44 }
 0x359   :  { %595 = vtanh.f32 %v298_v46 }
 0x35f   :  { %v596_v47 = vpop.eup %595 }
 0x360   :  { %573 = vmatmul.msk.f32.vlgmr.msrb.gmra.mxu0 %vm107_vm0, %v596_v47  ;;  %v410_v48 = vrot.slane %v596_v47, 1  ;;  %v411_v49 = vrot.slane %v596_v47, 2  ;;  %v412_v50 = vrot.slane %v596_v47, 3 }
 0x362   :  { %v413_v51 = vsel %vm355_vm3, %v596_v47, %v410_v48  ;;  %v414_v52 = vsel %vm357_vm4, %v411_v49, %v412_v50  ;;  %v416_v53 = vsel %vm361_vm1, %v596_v47, %v410_v48  ;;  %v417_v54 = vsel %vm363_vm2, %v411_v49, %v412_v50 }
 0x363   :  { %v415_v55 = vsel %vm359_vm6, %v413_v51, %v414_v52  ;;  %v418_v56 = vsel %vm365_vm5, %v416_v53, %v417_v54 }
 0x364   :  { %v457_v57 = vperm.slane %v415_v55, 0  ;;  %v419_v58 = vrot.slane %v418_v56, 1 }
 0x366   :  { %v480_v59 = vsel %vm479_vm9, %v477_v41, %v457_v57  ;;  %v458_v60 = vperm.slane %v419_v58, 0 }
 0x368   :  { %v481_v61 = vsel %vm479_vm9, %v478_v43, %v458_v60 }
 0x3dd   :  { %v320_v63 = vpop.f32.mrf.mxu0 }
 0x3de   :  { %v323_v0 = vadd.f32 %v320_v63, %v141_v62 }
 0x3e0   :  { %597 = vtanh.f32 %v323_v0 }
 0x3e6   :  { %v598_v1 = vpop.eup %597 }
 0x3e7   :  { %574 = vmatmul.msk.f32.vlgmr.msra.gmra.mxu1 %vm107_vm0, %v598_v1  ;;  %v420_v2 = vrot.slane %v598_v1, 1  ;;  %v421_v3 = vrot.slane %v598_v1, 2  ;;  %v422_v4 = vrot.slane %v598_v1, 3 }
 0x3e9   :  { %v423_v5 = vsel %vm355_vm3, %v598_v1, %v420_v2  ;;  %v424_v6 = vsel %vm357_vm4, %v421_v3, %v422_v4  ;;  %v426_v7 = vsel %vm361_vm1, %v598_v1, %v420_v2  ;;  %v427_v8 = vsel %vm363_vm2, %v421_v3, %v422_v4 }
 0x3ea   :  { %v425_v9 = vsel %vm359_vm6, %v423_v5, %v424_v6  ;;  %v428_v10 = vsel %vm365_vm5, %v426_v7, %v427_v8 }
 0x3eb   :  { %v461_v11 = vperm.slane %v425_v9, 0  ;;  %v429_v12 = vrot.slane %v428_v10, 1 }
 0x3ed   :  { %v483_v13 = vsel %vm482_vm10, %v480_v59, %v461_v11  ;;  %v462_v15 = vperm.slane %v429_v12, 0 }
 0x3ef   :  { %v484_v16 = vsel %vm482_vm10, %v481_v61, %v462_v15 }
 0x464   :  { %v345_v22 = vpop.f32.mrf.mxu1 }
 0x465   :  { %v348_v23 = vadd.f32 %v345_v22, %v142_v21 }
 0x467   :  { %599 = vtanh.f32 %v348_v23 }
 0x46d   :  { %v600_v24 = vpop.eup %599 }
 0x46e   :  { %v431_v25 = vrot.slane %v600_v24, 1  ;;  %v432_v26 = vrot.slane %v600_v24, 2  ;;  %v433_v28 = vrot.slane %v600_v24, 3  ;;  %351 = vst.msk [vmem:[#allocation8] sm:$0x3] %vm350_vm11, %v600_v24 }
 0x46f   :  { %552 = dma.vmem_to_hbm [thread:$0]  %s548_s18, 32, %s550_s21, [#allocation9]  }
 0x470   :  { %v434_v29 = vsel %vm355_vm3, %v600_v24, %v431_v25  ;;  %v435_v30 = vsel %vm357_vm4, %v432_v26, %v433_v28  ;;  %v437_v31 = vsel %vm361_vm1, %v600_v24, %v431_v25  ;;  %v438_v32 = vsel %vm363_vm2, %v432_v26, %v433_v28 }
 0x471   :  { %v436_v33 = vsel %vm359_vm6, %v434_v29, %v435_v30  ;;  %v439_v27 = vsel %vm365_vm5, %v437_v31, %v438_v32 }
 0x472   :  { %v465_v34 = vperm.slane %v436_v33, 0  ;;  %v440_v35 = vrot.slane %v439_v27, 1 }
 0x474   :  { %v486_v36 = vsel %vm485_vm12, %v483_v13, %v465_v34  ;;  %v466_v37 = vperm.slane %v440_v35, 0 }
 0x475   :  { %575 = vmatmul.msk.f32.vlgmr.msrb.gmra.mxu2 %vm107_vm0, %v486_v36 }
 0x476   :  { %v487_v14 = vsel %vm485_vm12, %v484_v16, %v466_v37 }
 0x47d   :  { %576 = vmatmul.msk.f32.gmra.mxu2 %vm107_vm0, %v487_v14 }
 0x4f8   :  { %v519_v39 = vpop.f32.mrf.mxu2 }
 0x4f9   :  { %v520_v40 = vadd.f32 %v584_v38, %v519_v39 }
 0x4fb   :  { %v525_v41 = vmax.f32 %v520_v40, 0.0 }
 0x4fd   :  { %527 = vst [vmem:[#allocation7] sm:$0xff] %v525_v41 }
 0x500   :  { %v522_v42 = vpop.f32.mrf.mxu2 }
 0x501   :  { %v523_v43 = vadd.f32 %v584_v38, %v522_v42 }
 0x503   :  { %v526_v44 = vmax.f32 %v523_v43, 0.0 }
 0x505   :  { %528 = vst [vmem:[#allocation7 + $0x8] sm:$0xff] %v526_v44 }
 0x506   :  { %541 = dma.vmem_to_hbm [thread:$0]  %s534_s25, 256, %s536_s28, [#allocation4], %s706_s13, %s706_s13, %s707_s14  }
 0x507   :  { %701 = dma.done.wait [#allocation4], 256  }
 0x508   :  { %702 = vsyncadd [#allocation4], 4294967040 }
 0x509   :  { %703 = dma.done.wait [#allocation9], 32  }
 0x50a   :  { %704 = vsyncadd [#allocation9], 4294967264 }
 0x50b   :  { %561 = vsyncpa [#allocation3], 1 }
 0x50c   :  { %562 = vsyncpa [#allocation6], 1 }
 0x50d   :  { %563 = vsyncpa [#allocation4], 1 }
 0x50e   :  { %564 = vsyncpa [#allocation9], 1 }

</bundles_post_ra>
